<compile_context>
chip_gen: v7x
topology: tpu7x:2x2x1
jax: 0.10.0
libtpu: 0.0.40
codegen_flags: <defaults>
</compile_context>

<pallas_src>
import jax
import jax.numpy as jnp
from jax.experimental import pallas as pl
from jax.experimental.pallas import tpu as pltpu


# ---------------------------------------------------------------------------
# Pallas kernels: whole-array or chunked HBM -> HBM DMA identity copy.
# ---------------------------------------------------------------------------
def _make_dma_identity_kernel(chunks):
    """Build the DMA-copy kernel.

    chunks is None            -> single whole-array DMA (scalar DMA semaphore).
    chunks = ((start, size),) -> one DMA per contiguous leading-axis slab,
                                 all started back-to-back, then all waited on
                                 (shaped DMA semaphore array).
    Chunk boundaries are static Python ints baked into the kernel.
    """
    if chunks is None:
        def kernel(x_hbm_ref, o_hbm_ref, copy_sem):
            copy = pltpu.make_async_copy(x_hbm_ref, o_hbm_ref, copy_sem)
            copy.start()
            copy.wait()
        return kernel

    def kernel(x_hbm_ref, o_hbm_ref, copy_sems):
        copies = []
        for i, (start, size) in enumerate(chunks):
            copy = pltpu.make_async_copy(
                x_hbm_ref.at[pl.ds(start, size)],
                o_hbm_ref.at[pl.ds(start, size)],
                copy_sems.at[i],
            )
            copy.start()          # issue all DMAs first (multiple in flight)
            copies.append(copy)
        for copy in copies:       # then drain completions
            copy.wait()
    return kernel


def _dma_identity_copy(x, *, target_chunk_bytes=32 * 1024 * 1024, max_chunks=8):
    """Materialize an identical copy of `x` via DMA-engine transfers.

    Both refs stay in HBM (pl.ANY): no VMEM round-trip, no TensorCore vld/vst,
    no per-generation VMEM budget to size. Large arrays are split into a few
    contiguous leading-axis chunks (tens of MiB each) so several DMA
    descriptors are in flight at once.
    """
    total_bytes = int(x.size) * x.dtype.itemsize

    # Decide the chunking (static, resolved at trace time).
    lead = x.shape[0] if x.ndim >= 1 else 1
    desired = max(1, min(max_chunks, total_bytes // max(1, target_chunk_bytes)))
    num_chunks = int(max(1, min(desired, lead)))

    if num_chunks <= 1 or x.ndim == 0:
        chunks = None
        sem_shape = pltpu.SemaphoreType.DMA(())
    else:
        base, rem = divmod(lead, num_chunks)
        chunks, start = [], 0
        for i in range(num_chunks):
            size = base + (1 if i < rem else 0)
            chunks.append((start, size))
            start += size
        chunks = tuple(chunks)
        sem_shape = pltpu.SemaphoreType.DMA((num_chunks,))

    return pl.pallas_call(
        _make_dma_identity_kernel(chunks),
        out_shape=jax.ShapeDtypeStruct(x.shape, x.dtype),
        in_specs=[pl.BlockSpec(memory_space=pl.ANY)],   # raw HBM ref, no auto-DMA
        out_specs=pl.BlockSpec(memory_space=pl.ANY),    # raw HBM ref, no auto-DMA
        scratch_shapes=[sem_shape],
        cost_estimate=pl.CostEstimate(
            flops=0, transcendentals=0, bytes_accessed=2 * total_bytes),
    )(x)


# ---------------------------------------------------------------------------
# Forward pass of ExampleModel (identity).
# ---------------------------------------------------------------------------
def example_model_forward(x, *, materialize_copy=True,
                          min_kernel_bytes=2 * 1024 * 1024,
                          force_pallas_kernel=False):
    """Identity forward of ExampleModel.

    materialize_copy=False : return x itself (exactly what PyTorch does — same
                             tensor, zero HBM traffic; equivalent to donating /
                             aliasing the input buffer and eliding the copy).
    materialize_copy=True  : always return a *distinct* but bit-identical
                             buffer. Inputs below `min_kernel_bytes` use XLA's
                             native copy op (launch overhead of a custom call
                             dwarfs the copy time there); larger inputs use the
                             Pallas chunked HBM->HBM DMA kernel.
    force_pallas_kernel    : route through the Pallas kernel regardless of size
                             (used for demonstration / testing).
    """
    if not materialize_copy:
        return x
    total_bytes = int(x.size) * x.dtype.itemsize
    if x.size == 0:
        return jnp.copy(x)
    if force_pallas_kernel:
        return _dma_identity_copy(x)
    if total_bytes < min_kernel_bytes:
        return jnp.copy(x)   # XLA copy HLO: peak DMA BW, fusable/elidable
    return _dma_identity_copy(x)


# ---------------------------------------------------------------------------
# Parameters declared by ExampleModel.__init__ — never consumed by forward().
# ---------------------------------------------------------------------------
def build_example_model_params():
    """Deterministic parameters matching ExampleModel.__init__ shapes (unused)."""
    return {
        # ExampleModel
        "param1": jnp.ones((1,), jnp.float32),
        "conv1_w": jnp.full((4, 3, 1, 1), 0.01, jnp.float32),      # Conv2d(3,4,1,bias=False)
        "conv2_w": jnp.full((2, 4, 1, 1), 0.02, jnp.float32),      # Conv2d(4,2,1)
        "conv2_b": jnp.zeros((2,), jnp.float32),
        "bn_gamma": jnp.ones((2,), jnp.float32),                   # BatchNorm2d(2)
        "bn_beta": jnp.zeros((2,), jnp.float32),
        "bn_running_mean": jnp.zeros((2,), jnp.float32),
        "bn_running_var": jnp.ones((2,), jnp.float32),
        # SubModel
        "sub_conv1_w": jnp.full((2, 1, 1, 1), 0.03, jnp.float32),  # Conv2d(2,2,1,groups=2)
        "sub_conv1_b": jnp.zeros((2,), jnp.float32),
        "sub_gn_gamma": jnp.ones((2,), jnp.float32),               # GroupNorm(2,2)
        "sub_gn_beta": jnp.zeros((2,), jnp.float32),
        "sub_param1": jnp.ones((1,), jnp.float32),
    }


if __name__ == "__main__":
    # Parameters exist for shape fidelity but are not consumed by the identity forward.
    _ = build_example_model_params()

    key = jax.random.PRNGKey(0)
    k_small, k_big = jax.random.split(key)

    # NCHW input; 3 channels matches conv1's declared in_channels.
    x = jax.random.normal(k_small, (2, 3, 16, 16), dtype=jnp.float32)

    # 1) Zero-copy path: faithful to PyTorch (forward returns the same tensor).
    y_zero = jax.block_until_ready(example_model_forward(x, materialize_copy=False))
    assert y_zero is x

    # 2) Default materialized path on a small input: distinct buffer via XLA copy.
    y_xla = jax.block_until_ready(example_model_forward(x))
    assert y_xla is not x
    assert y_xla.shape == x.shape and y_xla.dtype == x.dtype
    assert bool(jnp.all(y_xla == x))

    # 3) Force the Pallas whole-array HBM->HBM DMA kernel on the small input.
    y_kernel = jax.block_until_ready(example_model_forward(x, force_pallas_kernel=True))
    assert y_kernel.shape == x.shape and y_kernel.dtype == x.dtype
    assert bool(jnp.all(y_kernel == x))

    # 4) Exercise the chunked-DMA kernel path (multiple in-flight DMAs) by
    #    shrinking the per-chunk target so the 192 KiB input splits into 3 slabs.
    x_big = jax.random.normal(k_big, (4, 3, 64, 64), dtype=jnp.float32)
    y_big = jax.block_until_ready(
        _dma_identity_copy(x_big, target_chunk_bytes=64 * 1024, max_chunks=4))
    assert y_big.shape == x_big.shape and y_big.dtype == x_big.dtype
    assert bool(jnp.all(y_big == x_big))

    print("KERNEL_OK")
</pallas_src>

<mosaic_0001>
module attributes {stable_mosaic.version = 11 : i64} {
  func.func @kernel(%arg0: memref<2x3x16x16xf32, #tpu.memory_space<any>>, %arg1: memref<2x3x16x16xf32, #tpu.memory_space<any>>, %arg2: memref<!tpu.dma_semaphore, #tpu.memory_space<semaphore_mem>>) attributes {dimension_semantics = [], scalar_prefetch = 0 : i64, scratch_operands = 1 : i64, tpu.core_type = #tpu.core_type<tc>} {
    tpu.enqueue_dma source(%arg0 : memref<2x3x16x16xf32, #tpu.memory_space<any>>) target(%arg1 : memref<2x3x16x16xf32, #tpu.memory_space<any>>) target_semaphore(%arg2 : memref<!tpu.dma_semaphore, #tpu.memory_space<semaphore_mem>>)
    tpu.wait_dma2 semaphore(%arg2 : memref<!tpu.dma_semaphore, #tpu.memory_space<semaphore_mem>>) src(%arg0 : memref<2x3x16x16xf32, #tpu.memory_space<any>>) dst(%arg1 : memref<2x3x16x16xf32, #tpu.memory_space<any>>)
    return
  }
}

</mosaic_0001>

<bundles_post_ra>
// kernel: tpu_custom_call.1
= control target key start
LH: loop header
LB: loop body
LE: loop exit
PB: predicated region body
PF: predicated region fallthrough
CT: control target
= control target key end

     0   :  { %s36_s6 = smov [#allocation2]   ;;  %s37_s7 = smov [#allocation3]   ;;  %s55_s0 = inlined_call_operand.hbm [shape: f32[2,3,16,16], index: 0, kind: input, shape index: {}]   ;;  %s56_s1 = inlined_call_operand.hbm [shape: f32[2,3,16,16], index: 1, kind: output, shape index: {}]  }
   0x1   :  { %s38_s8 = smov 0  }
   0x2   :  { %18 = dma.general %s55_s0, 1536, %s56_s1, %s36_s6, %s37_s7, [#allocation4], %s38_s8, 0  }
   0x3   :  { %34 = dma.done.wait [#allocation2], 1536 }
   0x4   :  { %35 = vsyncadd [#allocation2], 4294965760 }
   0x5   :  { %24 = vsyncmov [#allocation2] }
   0x8   :  { %s25_s13 = vpop.sfrf %24 }
   0x9   :  { %p30_p0 = scmp.ne.s32.totalorder %s25_s13, 0 }
   0xb   :  { %29 = shalt.err (%p30_p0)  }

</bundles_post_ra>
